<compile_context>
chip_gen: v5e
topology: v5e:2x2
jax: 0.10.0
libtpu: 0.0.40
codegen_flags: <defaults>
</compile_context>

<pallas_src>
import functools

import jax
import jax.numpy as jnp
from jax.experimental import pallas as pl
from jax.experimental.pallas import tpu as pltpu

EPS = 1e-5
VMEM_LIMIT = 32 * 1024 * 1024   # >= scoped defaults on all of v5e/v6e/v7x


def _round_up(x, m):
    return (x + m - 1) // m * m


# ----------------------------- Pallas kernels ------------------------------ #

def _conv_stats_kernel(w_ref, p_ref, z_ref, sum_ref, ssq_ref):
    """Pass 1: z_tile = W^T @ patches^T (MXU, bf16 in / f32 acc) + per-channel
    sum / sum-of-squares accumulated across all M tiles."""
    i = pl.program_id(0)

    @pl.when(i == 0)
    def _():
        sum_ref[...] = jnp.zeros_like(sum_ref)
        ssq_ref[...] = jnp.zeros_like(ssq_ref)

    z = jnp.dot(w_ref[...], p_ref[...], preferred_element_type=jnp.float32)
    z_ref[...] = z
    sum_ref[...] += jnp.sum(z, axis=1, keepdims=True)
    ssq_ref[...] += jnp.sum(z * z, axis=1, keepdims=True)


def _bn_apply_kernel(z_ref, sum_ref, ssq_ref, g_ref, b_ref, o_ref, *, inv_m):
    """Pass 2: folded BN (scale/shift) + ReLU on a lane-dense [Cout, TM] tile."""
    mean = sum_ref[...] * inv_m                       # [Cout, 1]
    var = ssq_ref[...] * inv_m - mean * mean          # biased variance (training BN)
    scale = g_ref[...] * jax.lax.rsqrt(var + EPS)     # [Cout, 1], broadcast once per tile
    shift = b_ref[...] - mean * scale
    o_ref[...] = jnp.maximum(z_ref[...] * scale + shift, 0.0)


def _bn_add_apply_kernel(z_ref, sum_ref, ssq_ref, g_ref, b_ref, id_ref, o_ref,
                         *, inv_m):
    """Pass 2 with residual add: folded BN + identity + ReLU."""
    mean = sum_ref[...] * inv_m
    var = ssq_ref[...] * inv_m - mean * mean
    scale = g_ref[...] * jax.lax.rsqrt(var + EPS)
    shift = b_ref[...] - mean * scale
    o_ref[...] = jnp.maximum(z_ref[...] * scale + shift + id_ref[...], 0.0)


# ---------------------------- pallas_call wrappers -------------------------- #

def conv_stats(pT, wT, tm):
    """pT: [K, Mp] bf16, wT: [Cout, K] bf16 -> (z [Cout, Mp] f32, sum, sumsq)."""
    K, Mp = pT.shape
    Cout = wT.shape[0]
    nt = Mp // tm
    vec = pl.BlockSpec((Cout, 1), lambda i: (0, 0))
    return pl.pallas_call(
        _conv_stats_kernel,
        out_shape=(jax.ShapeDtypeStruct((Cout, Mp), jnp.float32),
                   jax.ShapeDtypeStruct((Cout, 1), jnp.float32),
                   jax.ShapeDtypeStruct((Cout, 1), jnp.float32)),
        grid=(nt,),
        in_specs=[pl.BlockSpec((Cout, K), lambda i: (0, 0)),     # weights resident
                  pl.BlockSpec((K, tm), lambda i: (0, i))],      # patch tile streamed
        out_specs=(pl.BlockSpec((Cout, tm), lambda i: (0, i)),
                   vec, vec),                                    # stat accumulators resident
        compiler_params=pltpu.CompilerParams(
            dimension_semantics=("arbitrary",),                  # cross-tile stats accumulation
            vmem_limit_bytes=VMEM_LIMIT),
    )(wT, pT)


def bn_apply(z, ssum, ssq, gamma, beta, inv_m, tm, ident=None):
    """z: [Cout, Mp] f32 -> folded-BN (+identity) + ReLU, tiled over M."""
    Cout, Mp = z.shape
    nt = Mp // tm
    tile = pl.BlockSpec((Cout, tm), lambda i: (0, i))
    vec = pl.BlockSpec((Cout, 1), lambda i: (0, 0))
    if ident is None:
        kernel = functools.partial(_bn_apply_kernel, inv_m=inv_m)
        in_specs = [tile, vec, vec, vec, vec]
        args = (z, ssum, ssq, gamma, beta)
    else:
        kernel = functools.partial(_bn_add_apply_kernel, inv_m=inv_m)
        in_specs = [tile, vec, vec, vec, vec, tile]
        args = (z, ssum, ssq, gamma, beta, ident)
    return pl.pallas_call(
        kernel,
        out_shape=jax.ShapeDtypeStruct((Cout, Mp), jnp.float32),
        grid=(nt,),
        in_specs=in_specs,
        out_specs=tile,
        compiler_params=pltpu.CompilerParams(
            dimension_semantics=("parallel",),                   # independent tiles (v7x 2 TCs)
            vmem_limit_bytes=VMEM_LIMIT),
    )(*args)


# ------------------------------ JAX layout glue ----------------------------- #

def _im2col_T(x_pad, Ho, Wo, sh, sw, Mp):
    """Transposed im2col: [9*Cin, Mp] bf16, K ordered (kh, kw, ci), M ordered
    (n, oh, ow) so M lands on the lane axis inside the kernel."""
    taps = [x_pad[:, kh:kh + (Ho - 1) * sh + 1:sh,
                  kw:kw + (Wo - 1) * sw + 1:sw, :]
            for kh in range(3) for kw in range(3)]
    p = jnp.stack(taps, axis=0)                    # [9, N, Ho, Wo, Cin]
    p = jnp.transpose(p, (0, 4, 1, 2, 3))          # [9, Cin, N, Ho, Wo]
    K = 9 * p.shape[1]
    M = p.shape[2] * Ho * Wo
    p = p.reshape(K, M)
    if Mp > M:
        p = jnp.pad(p, ((0, 0), (0, Mp - M)))      # zero columns: no effect on stats
    return p.astype(jnp.bfloat16)


def base_residual_block(x_nchw, params, stride=(2, 2), tile_m=512):
    """Forward of BaseResidualBlock.  x_nchw: [N, Cin, H, W] float32."""
    w1, g1, b1, w2, g2, b2 = params                # w1: [3,3,Cin,Cout], w2: [3,3,Cout,Cout]
    N, Cin, H, W = x_nchw.shape
    Cout = w1.shape[-1]
    sh, sw = stride
    Ho = (H + 2 - 3) // sh + 1
    Wo = (W + 2 - 3) // sw + 1
    M = N * Ho * Wo
    # Lane-dense M tile, multiple of 128 (128-aligned works on v5e; bump tile_m
    # to 512+/256-multiples for v6e/v7x at larger M; re-derive for v7x's 64 MiB VMEM).
    tm = min(tile_m, _round_up(M, 128))
    Mp = _round_up(M, tm)
    inv_m = 1.0 / float(M)

    x = jnp.transpose(x_nchw, (0, 2, 3, 1))        # NHWC (channels contiguous)

    # ---- conv1 + bn1 + relu ----
    xp = jnp.pad(x, ((0, 0), (1, 1), (1, 1), (0, 0)))
    p1 = _im2col_T(xp, Ho, Wo, sh, sw, Mp)                         # [9*Cin, Mp] bf16
    w1T = jnp.transpose(w1.reshape(9 * Cin, Cout)).astype(jnp.bfloat16)   # [Cout, 9*Cin]
    z1, s1, q1 = conv_stats(p1, w1T, tm)
    y1 = bn_apply(z1, s1, q1, g1.reshape(Cout, 1).astype(jnp.float32),
                  b1.reshape(Cout, 1).astype(jnp.float32), inv_m, tm)     # [Cout, Mp] f32

    # ---- conv2 + bn2 + identity + relu ----
    y1_nhwc = jnp.transpose(y1[:, :M].reshape(Cout, N, Ho, Wo), (1, 2, 3, 0))
    y1p = jnp.pad(y1_nhwc, ((0, 0), (1, 1), (1, 1), (0, 0)))
    p2 = _im2col_T(y1p, Ho, Wo, 1, 1, Mp)                          # [9*Cout, Mp] bf16
    w2T = jnp.transpose(w2.reshape(9 * Cout, Cout)).astype(jnp.bfloat16)

    if stride != (1, 1) or Cin != Cout:
        # option-A shortcut: spatial subsample by 2, zero-pad channels by Cout//4 each side
        # (assumes Cin == Cout // 2, as in the PyTorch module's intended use)
        ident = x[:, ::2, ::2, :]
        pc = Cout // 4
        ident = jnp.pad(ident, ((0, 0), (0, 0), (0, 0), (pc, pc)))
    else:
        ident = x
    identT = jnp.transpose(ident, (3, 0, 1, 2)).reshape(Cout, M).astype(jnp.float32)
    if Mp > M:
        identT = jnp.pad(identT, ((0, 0), (0, Mp - M)))

    z2, s2, q2 = conv_stats(p2, w2T, tm)
    out = bn_apply(z2, s2, q2, g2.reshape(Cout, 1).astype(jnp.float32),
                   b2.reshape(Cout, 1).astype(jnp.float32), inv_m, tm, ident=identT)

    out = out[:, :M].reshape(Cout, N, Ho, Wo)
    return jnp.transpose(out, (1, 0, 2, 3))        # NCHW


# ------------------------- pure-JAX reference ------------------------------ #

def _ref_forward(x, params, stride):
    w1, g1, b1, w2, g2, b2 = params

    def conv(x, w, s):
        wk = jnp.transpose(w, (3, 2, 0, 1))        # OIHW
        return jax.lax.conv_general_dilated(
            x, wk, window_strides=s, padding=((1, 1), (1, 1)),
            dimension_numbers=('NCHW', 'OIHW', 'NCHW'))

    def bn(x, g, b):
        m = x.mean(axis=(0, 2, 3), keepdims=True)
        v = ((x - m) ** 2).mean(axis=(0, 2, 3), keepdims=True)
        return (x - m) / jnp.sqrt(v + EPS) * g.reshape(1, -1, 1, 1) + b.reshape(1, -1, 1, 1)

    Cout = w1.shape[-1]
    y = jax.nn.relu(bn(conv(x, w1, stride), g1, b1))
    y = bn(conv(y, w2, (1, 1)), g2, b2)
    ident = x
    if stride != (1, 1) or x.shape[1] != Cout:
        ident = x[:, :, ::2, ::2]
        pc = Cout // 4
        ident = jnp.pad(ident, ((0, 0), (pc, pc), (0, 0), (0, 0)))
    return jax.nn.relu(y + ident)


# ---------------------------------- main ------------------------------------ #

if __name__ == "__main__":
    key = jax.random.PRNGKey(0)
    k_x, k_w1, k_g1, k_b1, k_w2, k_g2, k_b2 = jax.random.split(key, 7)

    N, Cin, H, W = 2, 4, 16, 16
    Cout = 8
    stride = (2, 2)                                  # triggers the option-A shortcut

    x = jax.random.normal(k_x, (N, Cin, H, W), jnp.float32)

    # deterministic synthetic parameters (shapes from the module's __init__)
    w1 = 0.1 * jax.random.normal(k_w1, (3, 3, Cin, Cout), jnp.float32)   # conv1 (no bias)
    g1 = 1.0 + 0.1 * jax.random.normal(k_g1, (Cout,), jnp.float32)       # bn1 weight
    b1 = 0.1 * jax.random.normal(k_b1, (Cout,), jnp.float32)             # bn1 bias
    w2 = 0.1 * jax.random.normal(k_w2, (3, 3, Cout, Cout), jnp.float32)  # conv2 (no bias)
    g2 = 1.0 + 0.1 * jax.random.normal(k_g2, (Cout,), jnp.float32)       # bn2 weight
    b2 = 0.1 * jax.random.normal(k_b2, (Cout,), jnp.float32)             # bn2 bias
    params = (w1, g1, b1, w2, g2, b2)

    out = jax.block_until_ready(base_residual_block(x, params, stride))
    ref = jax.block_until_ready(_ref_forward(x, params, stride))

    assert out.shape == (N, Cout, H // 2, W // 2)
    # bf16 matmul inputs (f32 accumulation) -> looser tolerance vs f32 reference
    assert jnp.allclose(out, ref, atol=5e-2, rtol=5e-2), float(jnp.max(jnp.abs(out - ref)))

    print("KERNEL_OK")
</pallas_src>

<mosaic_0001>
module attributes {stable_mosaic.version = 11 : i64} {
  func.func @_conv_stats_kernel(%arg0: i32, %arg1: memref<8x36xbf16, #tpu.memory_space<vmem>>, %arg2: memref<36x128xbf16, #tpu.memory_space<vmem>>, %arg3: memref<8x128xf32, #tpu.memory_space<vmem>>, %arg4: memref<8x1xf32, #tpu.memory_space<vmem>>, %arg5: memref<8x1xf32, #tpu.memory_space<vmem>>) attributes {dimension_semantics = [#tpu.dimension_semantics<arbitrary>], iteration_bounds = array<i64: 1>, scalar_prefetch = 0 : i64, scratch_operands = 0 : i64, tpu.core_type = #tpu.core_type<tc>, window_params = [{pipeline_mode = #tpu.pipeline_mode<synchronous>, transform_indices = @transform_0, window_bounds = array<i64: 8, 36>}, {transform_indices = @transform_1, window_bounds = array<i64: 36, 128>}, {transform_indices = @transform_2, window_bounds = array<i64: 8, 128>}, {pipeline_mode = #tpu.pipeline_mode<synchronous>, transform_indices = @transform_3, window_bounds = array<i64: 8, 1>}, {pipeline_mode = #tpu.pipeline_mode<synchronous>, transform_indices = @transform_4, window_bounds = array<i64: 8, 1>}]} {
    %c0_i32 = arith.constant 0 : i32
    %0 = arith.cmpi eq, %arg0, %c0_i32 : i32
    %1 = arith.extui %0 : i1 to i32
    %c0_i32_0 = arith.constant 0 : i32
    %2 = arith.cmpi ne, %1, %c0_i32_0 : i32
    scf.if %2 {
      %cst_16 = arith.constant 0.000000e+00 : f32
      %18 = vector.broadcast %cst_16 : f32 to vector<8x1xf32>
      %c0_17 = arith.constant 0 : index
      %c0_18 = arith.constant 0 : index
      %19 = vector.load %arg4[%c0_17, %c0_18] : memref<8x1xf32, #tpu.memory_space<vmem>>, vector<8x1xf32>
      tpu.vector_store %arg4[%c0_17, %c0_18], %18 {strides = array<i32>} : memref<8x1xf32, #tpu.memory_space<vmem>>, vector<8x1xf32>,
      %cst_19 = arith.constant 0.000000e+00 : f32
      %20 = vector.broadcast %cst_19 : f32 to vector<8x1xf32>
      %c0_20 = arith.constant 0 : index
      %c0_21 = arith.constant 0 : index
      %21 = vector.load %arg5[%c0_20, %c0_21] : memref<8x1xf32, #tpu.memory_space<vmem>>, vector<8x1xf32>
      tpu.vector_store %arg5[%c0_20, %c0_21], %20 {strides = array<i32>} : memref<8x1xf32, #tpu.memory_space<vmem>>, vector<8x1xf32>,
    } else {
    }
    %c0 = arith.constant 0 : index
    %c0_1 = arith.constant 0 : index
    %3 = vector.load %arg1[%c0, %c0_1] : memref<8x36xbf16, #tpu.memory_space<vmem>>, vector<8x36xbf16>
    %c0_2 = arith.constant 0 : index
    %c0_3 = arith.constant 0 : index
    %4 = vector.load %arg2[%c0_2, %c0_3] : memref<36x128xbf16, #tpu.memory_space<vmem>>, vector<36x128xbf16>
    %cst = arith.constant dense<0.000000e+00> : vector<8x128xf32>
    %5 = tpu.matmul %3, %4, %cst {dimension_numbers = #tpu.dot_dimension_numbers<[1], [0], [0], [1], [0, 0, 1, 1], [], []>} : vector<8x36xbf16>, vector<36x128xbf16>, vector<8x128xf32> -> vector<8x128xf32>
    %c0_4 = arith.constant 0 : index
    %c0_5 = arith.constant 0 : index
    %6 = vector.load %arg3[%c0_4, %c0_5] : memref<8x128xf32, #tpu.memory_space<vmem>>, vector<8x128xf32>
    tpu.vector_store %arg3[%c0_4, %c0_5], %5 {strides = array<i32>} : memref<8x128xf32, #tpu.memory_space<vmem>>, vector<8x128xf32>,
    %c0_6 = arith.constant 0 : index
    %c0_7 = arith.constant 0 : index
    %7 = vector.load %arg4[%c0_6, %c0_7] : memref<8x1xf32, #tpu.memory_space<vmem>>, vector<8x1xf32>
    %cst_8 = arith.constant dense<0.000000e+00> : vector<8xf32>
    %8 = vector.multi_reduction <add>, %5, %cst_8 [1] : vector<8x128xf32> to vector<8xf32>
    %9 = vector.shape_cast %8 : vector<8xf32> to vector<8x1xf32>
    %10 = arith.addf %7, %9 : vector<8x1xf32>
    %c0_9 = arith.constant 0 : index
    %c0_10 = arith.constant 0 : index
    %11 = vector.load %arg4[%c0_9, %c0_10] : memref<8x1xf32, #tpu.memory_space<vmem>>, vector<8x1xf32>
    tpu.vector_store %arg4[%c0_9, %c0_10], %10 {strides = array<i32>} : memref<8x1xf32, #tpu.memory_space<vmem>>, vector<8x1xf32>,
    %c0_11 = arith.constant 0 : index
    %c0_12 = arith.constant 0 : index
    %12 = vector.load %arg5[%c0_11, %c0_12] : memref<8x1xf32, #tpu.memory_space<vmem>>, vector<8x1xf32>
    %13 = arith.mulf %5, %5 : vector<8x128xf32>
    %cst_13 = arith.constant dense<0.000000e+00> : vector<8xf32>
    %14 = vector.multi_reduction <add>, %13, %cst_13 [1] : vector<8x128xf32> to vector<8xf32>
    %15 = vector.shape_cast %14 : vector<8xf32> to vector<8x1xf32>
    %16 = arith.addf %12, %15 : vector<8x1xf32>
    %c0_14 = arith.constant 0 : index
    %c0_15 = arith.constant 0 : index
    %17 = vector.load %arg5[%c0_14, %c0_15] : memref<8x1xf32, #tpu.memory_space<vmem>>, vector<8x1xf32>
    tpu.vector_store %arg5[%c0_14, %c0_15], %16 {strides = array<i32>} : memref<8x1xf32, #tpu.memory_space<vmem>>, vector<8x1xf32>,
    return
  }
  func.func @transform_0(%arg0: i32) -> (i32, i32) {
    %c0_i32 = arith.constant 0 : i32
    %c0_i32_0 = arith.constant 0 : i32
    %c0_i32_1 = arith.constant 0 : i32
    return %c0_i32, %c0_i32_0 : i32, i32
  }
  func.func @transform_1(%arg0: i32) -> (i32, i32) {
    %c0_i32 = arith.constant 0 : i32
    %c0_i32_0 = arith.constant 0 : i32
    return %c0_i32, %arg0 : i32, i32
  }
  func.func @transform_2(%arg0: i32) -> (i32, i32) {
    %c0_i32 = arith.constant 0 : i32
    %c0_i32_0 = arith.constant 0 : i32
    return %c0_i32, %arg0 : i32, i32
  }
  func.func @transform_3(%arg0: i32) -> (i32, i32) {
    %c0_i32 = arith.constant 0 : i32
    %c0_i32_0 = arith.constant 0 : i32
    %c0_i32_1 = arith.constant 0 : i32
    return %c0_i32, %c0_i32_0 : i32, i32
  }
  func.func @transform_4(%arg0: i32) -> (i32, i32) {
    %c0_i32 = arith.constant 0 : i32
    %c0_i32_0 = arith.constant 0 : i32
    %c0_i32_1 = arith.constant 0 : i32
    return %c0_i32, %c0_i32_0 : i32, i32
  }
}

</mosaic_0001>

<bundles_post_ra>
// kernel: tpu_custom_call.1
= control target key start
LH: loop header
LB: loop body
LE: loop exit
PB: predicated region body
PF: predicated region fallthrough
CT: control target
= control target key end

     0   :  { %10 = vsyncpa [#allocation3], 0  ;;  %s291_s0 = inlined_call_operand.hbm [shape: bf16[8,36], index: 0, kind: input, shape index: {}]   ;;  %s292_s1 = inlined_call_operand.hbm [shape: bf16[36,128], index: 1, kind: input, shape index: {}]   ;;  %s293_s2 = inlined_call_operand.hbm [shape: f32[8,128], index: 2, kind: output, shape index: {0}]   ;;  %s294_s3 = inlined_call_operand.vmem [shape: f32[8,1], index: 3, kind: output, shape index: {1}]   ;;  %s295_s4 = inlined_call_operand.vmem [shape: f32[8,1], index: 4, kind: output, shape index: {2}]  }
   0x1   :  { %11 = vsyncpa [#allocation6], 0 }
   0x2   :  { %12 = vsyncpa [#allocation4], 0  ;;  %s18_s17 = sshll.u32 %s291_s0, 4  ;;  %s229_s18 = smov [#allocation2]   ;;  %s19_s17 = int_to_ptr.hbm [resolvable:$true] %s18_s17 }
   0x3   :  { %s20_s19 = sshll.u32 %s229_s18, 4  ;;  %s28_s22 = sshll.u32 %s292_s1, 4  ;;  %s21_s19 = int_to_ptr.vmem [resolvable:$true] %s20_s19  ;;  %s29_s22 = int_to_ptr.hbm [resolvable:$true] %s28_s22 }
   0x4   :  { %23 = dma.hbm_to_vmem [thread:$0]  %s19_s17, 64, %s21_s19, [#allocation3]  }
   0x5   :  { %s230_s23 = smov [#allocation5]   ;;  %s231_s25 = smov 64  }
   0x6   :  { %s30_s24 = sshll.u32 %s230_s23, 4  ;;  %s232_s26 = smov 4   ;;  %s31_s24 = int_to_ptr.vmem [resolvable:$true] %s30_s24 }
   0x7   :  { %36 = dma.hbm_to_vmem [thread:$0]  %s29_s22, 320, %s31_s24, [#allocation6], %s231_s25, %s231_s25, %s232_s26  }
   0x8   :  { %223 = dma.done.wait [#allocation3], 64  }
   0x9   :  { %224 = vsyncadd [#allocation3], 4294967232 }
   0xa   :  { %225 = dma.done.wait [#allocation6], 320  }
   0xb   :  { %226 = vsyncadd [#allocation6], 4294966976  ;;  %v58_v0 = vld [vmem:[#allocation5 + $0x10] sm:$0x3]  ;;  %vm78_vm0 = vcmask 1041408   ;;  %v144_v4 = vld [vmem:[#allocation5 + $0x8] sm:$0xff] }
   0xc   :  { %v68_v1 = vunpack.c.l.b16 %v58_v0  ;;  %v143_v5 = vld [vmem:[#allocation5] sm:$0xff]  ;;  %v53_v6 = vld [vmem:[#allocation2] sm:$0xf]  ;;  %vm74_vm1 = vcmask 293888   ;;  %vm50_vm2 = vcmask 7168   ;;  %v233_v7 = vmov 0.0  }
   0xd   :  { %51 = vst.msk [vmem:[%s294_s3] sm:$0xff] %vm50_vm2, %v233_v7  ;;  %s234_s29 = smov [#allocation7]   ;;  %s115_s7 = sshll.u32 %s293_s2, 4  ;;  %s116_s7 = int_to_ptr.hbm [resolvable:$true] %s115_s7 }
   0xe   :  { %v71_v2 = vpack.c.b16 %v68_v1, %v68_v1  ;;  %52 = vst.msk [vmem:[%s295_s4] sm:$0xff] %vm50_vm2, %v233_v7  ;;  %s113_s30 = sshll.u32 %s234_s29, 4  ;;  %s114_s30 = int_to_ptr.vmem [resolvable:$true] %s113_s30 }
  0x10   :  { %v80_v3 = vsel %vm78_vm0, %v71_v2, 0 }
  0x11   :  { %87 = vmatpush.bf16.msra.mxu0 %v80_v3 }
  0x14   :  { %v96_v11 = vld [vmem:[%s294_s3] sm:$0xff] }
  0x15   :  { %88 = vmatpush.bf16.msra.mxu0 %v144_v4  ;;  %v102_v14 = vld [vmem:[%s295_s4] sm:$0xff] }
  0x19   :  { %89 = vmatpush.bf16.msra.mxu0 %v143_v5 }
  0x1c   :  { %142 = vmatmul.msk.bf16.vlgmr.msra.gmra.mxu0 %vm74_vm1, %v53_v6 }
  0x99   :  { %v91_v8 = vpop.f32.mrf.mxu0 }
  0x9a   :  { %95 = vst [vmem:[#allocation7] sm:$0xff] %v91_v8  ;;  %97 = vadd.xlane.f32.xlu0 %v91_v8  ;;  %v103_v9 = vmul.f32 %v91_v8, %v91_v8 }
  0x9b   :  { %118 = dma.vmem_to_hbm [thread:$0]  %s114_s30, 128, %s116_s7, [#allocation4]  }
  0xa1   :  { %v93_v10 = vpop.f32.mrf.mxu0 }
  0xa2   :  { %104 = vadd.xlane.f32.xlu0 %v103_v9 }
 0x10d   :  { %v98_v12 = vpop.xlane.xlu0 %97 }
 0x10e   :  { %v99_v13 = vadd.f32 %v98_v12, %v96_v11 }
 0x110   :  { %101 = vst.msk [vmem:[%s294_s3] sm:$0xff] %vm50_vm2, %v99_v13 }
 0x115   :  { %v105_v15 = vpop.xlane.xlu0 %104 }
 0x116   :  { %v106_v16 = vadd.f32 %v105_v15, %v102_v14 }
 0x118   :  { %107 = vst.msk [vmem:[%s295_s4] sm:$0xff] %vm50_vm2, %v106_v16 }
 0x119   :  { %227 = dma.done.wait [#allocation4], 128  }
 0x11a   :  { %228 = vsyncadd [#allocation4], 4294967168 }
 0x11b   :  { %131 = vsyncpa [#allocation3], 1 }
 0x11c   :  { %132 = vsyncpa [#allocation6], 1 }
 0x11d   :  { %133 = vsyncpa [#allocation4], 1 }

</bundles_post_ra>
